<compile_context>
chip_gen: v7x
topology: tpu7x:2x2x1
jax: 0.10.0
libtpu: 0.0.40
codegen_flags: <defaults>
</compile_context>

<pallas_src>
import functools
import math

import jax
import jax.numpy as jnp
from jax import lax
from jax.experimental import pallas as pl
from jax.experimental.pallas import tpu as pltpu

B, S, H, V = 2, 8, 32, 64          # batch, seq, hidden, vocab
FF = 4 * H
EOS_ID = 2
NEG_INF = -1e30
LANES = 128                        # slab row width / lane-dense output width
B_PAD = 8                          # output sublane padding (>= B, one sublane tile)


def _ceil_lanes(x):
    return ((x + LANES - 1) // LANES) * LANES


# fused bf16 weight-slab lane offsets (derived from H/FF; each segment at a 128-lane boundary)
OFF_QKV = 0
OFF_O = OFF_QKV + _ceil_lanes(3 * H)
OFF_FC1 = OFF_O + _ceil_lanes(H)
W1_COLS = OFF_FC1 + _ceil_lanes(FF)

# fused f32 vector-slab row layout
(ROW_LN1_G, ROW_LN1_B, ROW_LN2_G, ROW_LN2_B, ROW_LNF_G, ROW_LNF_B,
 ROW_B_QKV, ROW_B_O, ROW_B_FC1, ROW_B_FC2, ROW_VHEAD) = range(11)
ROW_BIAS = 11                      # rows ROW_BIAS .. ROW_BIAS+S-1: additive causal bias
VEC_ROWS = ROW_BIAS + S


def _layernorm(x, g, b, eps=1e-5):
    mu = jnp.mean(x, axis=-1, keepdims=True)
    var = jnp.mean((x - mu) ** 2, axis=-1, keepdims=True)
    return (x - mu) * lax.rsqrt(var + eps) * g + b


def _softmax_last(x):
    m = jnp.max(x, axis=-1, keepdims=True)
    e = jnp.exp(x - m)
    return e * pl.reciprocal(jnp.sum(e, axis=-1, keepdims=True), approx=True)


# ----------------------------- Pallas kernel ---------------------------------
def reward_kernel(sel_ref, x_ref, vec_ref, w1_ref, w2_ref, out_ref,
                  *, batch, seq_len, hidden, ff):
    n = batch * seq_len
    bf16 = jnp.bfloat16

    x = x_ref[...]                                   # (B*S, H) f32 residual stream

    # hoisted parameter-slab slices (static slices; used once or twice each)
    vec = vec_ref[...]                               # (VEC_ROWS, 128) f32
    ln1_g = vec[ROW_LN1_G:ROW_LN1_G + 1, :hidden]
    ln1_b = vec[ROW_LN1_B:ROW_LN1_B + 1, :hidden]
    ln2_g = vec[ROW_LN2_G:ROW_LN2_G + 1, :hidden]
    ln2_b = vec[ROW_LN2_B:ROW_LN2_B + 1, :hidden]
    lnf_g = vec[ROW_LNF_G:ROW_LNF_G + 1, :hidden]
    lnf_b = vec[ROW_LNF_B:ROW_LNF_B + 1, :hidden]
    b_qkv = vec[ROW_B_QKV:ROW_B_QKV + 1, :3 * hidden]
    b_o   = vec[ROW_B_O:ROW_B_O + 1, :hidden]
    b_fc1 = vec[ROW_B_FC1:ROW_B_FC1 + 1, :ff]
    b_fc2 = vec[ROW_B_FC2:ROW_B_FC2 + 1, :hidden]
    vhead = vec[ROW_VHEAD:ROW_VHEAD + 1, :hidden]
    causal_bias = vec[ROW_BIAS:ROW_BIAS + seq_len, :seq_len]     # (S, S) additive 0/NEG_INF

    w1 = w1_ref[...]                                 # (H, W1_COLS) bf16
    w_qkv = w1[:, OFF_QKV:OFF_QKV + 3 * hidden]      # (H, 3H)  (q columns pre-scaled by 1/sqrt(H))
    w_o   = w1[:, OFF_O:OFF_O + hidden]              # (H, H)
    w_fc1 = w1[:, OFF_FC1:OFF_FC1 + ff]              # (H, FF)
    w_fc2 = w2_ref[...]                              # (FF, H) bf16

    # ---- transformer block (pre-LN, single-head causal attention) ----
    # TODO(synk): original HF transformer is multi-head / multi-layer; synthetic single block here.
    h = _layernorm(x, ln1_g, ln1_b)
    qkv = jnp.dot(h.astype(bf16), w_qkv, preferred_element_type=jnp.float32) + b_qkv
    qkv = qkv.astype(bf16)                           # single f32->bf16 cast for q/k/v
    q = qkv[:, :hidden].reshape(batch, seq_len, hidden)
    k = qkv[:, hidden:2 * hidden].reshape(batch, seq_len, hidden)
    v = qkv[:, 2 * hidden:3 * hidden].reshape(batch, seq_len, hidden)

    # per-batch attention: no materialized k^T, scores footprint is S^2 per batch (not (B*S)^2)
    scores = jnp.einsum("bqd,bkd->bqk", q, k,
                        preferred_element_type=jnp.float32)       # (B, S, S) f32
    scores = scores + causal_bias                                 # additive causal mask (const)
    p = _softmax_last(scores)                                     # f32
    attn = jnp.einsum("bqk,bkd->bqd", p.astype(bf16), v,
                      preferred_element_type=jnp.float32)         # (B, S, H) f32
    attn = attn.reshape(n, hidden)

    attn = jnp.dot(attn.astype(bf16), w_o, preferred_element_type=jnp.float32) + b_o
    x = x + attn

    h2 = _layernorm(x, ln2_g, ln2_b)
    ffv = jnp.dot(h2.astype(bf16), w_fc1, preferred_element_type=jnp.float32) + b_fc1
    ffv = jax.nn.gelu(ffv, approximate=True)
    ffv = jnp.dot(ffv.astype(bf16), w_fc2, preferred_element_type=jnp.float32) + b_fc2
    x = x + ffv

    # ---- gather first, project second ----
    # One-hot (B_PAD, B*S) MXU gather of the first-EOS rows (exact: weights are 0/1 in f32),
    # then final LayerNorm + v_head lane-reduction on only B_PAD rows.
    xg = jnp.dot(sel_ref[...], x, preferred_element_type=jnp.float32)   # (B_PAD, H) f32
    xg = _layernorm(xg, lnf_g, lnf_b)
    rewards = jnp.sum(xg * vhead, axis=-1, keepdims=True)               # (B_PAD, 1) f32

    # lane-dense (B_PAD, 128) unmasked store; wrapper slices [:B, 0]
    out_ref[...] = jnp.broadcast_to(rewards, (B_PAD, LANES))


# --------------------------- one-time parameter packing ------------------------
def pack_params(params):
    """Pack the 15 small parameter arrays into 3 kernel slabs.  Call ONCE, reuse per forward."""
    f32 = jnp.float32
    inv_sqrt_h = 1.0 / math.sqrt(H)
    # fold the attention scale into the q columns of w_qkv / b_qkv
    w_qkv = params["w_qkv"].astype(f32).at[:, :H].multiply(inv_sqrt_h)
    b_qkv = params["b_qkv"].astype(f32).at[:, :H].multiply(inv_sqrt_h)

    def pad_row(vv):
        vv = jnp.asarray(vv, f32).reshape(-1)
        return jnp.pad(vv, (0, LANES - vv.shape[0]))

    causal_bias = jnp.where(jnp.tril(jnp.ones((S, S), bool)), 0.0, NEG_INF).astype(f32)
    causal_rows = jnp.pad(causal_bias, ((0, 0), (0, LANES - S)))         # (S, 128)

    vec = jnp.concatenate([
        jnp.stack([
            pad_row(params["ln1_g"]), pad_row(params["ln1_b"]),
            pad_row(params["ln2_g"]), pad_row(params["ln2_b"]),
            pad_row(params["lnf_g"]), pad_row(params["lnf_b"]),
            pad_row(b_qkv), pad_row(params["b_o"]),
            pad_row(params["b_fc1"]), pad_row(params["b_fc2"]),
            pad_row(params["v_head"]),
        ]),
        causal_rows,
    ], axis=0)                                                           # (VEC_ROWS, 128) f32

    def pad_cols(w, width):
        w = jnp.asarray(w, f32)
        return jnp.pad(w, ((0, 0), (0, width - w.shape[1])))

    w1 = jnp.concatenate([
        pad_cols(w_qkv, _ceil_lanes(3 * H)),
        pad_cols(params["w_o"], _ceil_lanes(H)),
        pad_cols(params["w_fc1"], _ceil_lanes(FF)),
    ], axis=1).astype(jnp.bfloat16)                                      # (H, W1_COLS) bf16
    w2 = params["w_fc2"].astype(jnp.bfloat16)                            # (FF, H) bf16

    return {"wte": params["wte"].astype(f32), "wpe": params["wpe"].astype(f32),
            "vec": vec, "w1": w1, "w2": w2}


# ------------------------------ per-call wrapper --------------------------------
@jax.jit
def reward_model_forward(input_ids, packed):
    # TODO(synk): embedding lookup (wte/wpe gather) stays in plain JAX glue outside the kernel.
    emb = packed["wte"][input_ids] + packed["wpe"][jnp.arange(S)][None]      # (B, S, H)
    x2d = emb.reshape(B * S, H).astype(jnp.float32)

    # first-EOS index per row (0 if none) -> one-hot gather matrix for the kernel's MXU gather
    ends = jnp.argmax((input_ids == EOS_ID).astype(jnp.float32), axis=1).astype(jnp.int32)
    targets = ends + jnp.arange(B, dtype=jnp.int32) * S                      # flat row indices
    targets = jnp.concatenate([targets, jnp.full((B_PAD - B,), -1, jnp.int32)])
    sel = (jnp.arange(B * S, dtype=jnp.int32)[None, :] == targets[:, None]).astype(jnp.float32)

    out = pl.pallas_call(
        functools.partial(reward_kernel, batch=B, seq_len=S, hidden=H, ff=FF),
        out_shape=jax.ShapeDtypeStruct((B_PAD, LANES), jnp.float32),
        grid_spec=pltpu.PrefetchScalarGridSpec(
            num_scalar_prefetch=0,
            grid=(1,),                                   # single step: batch folded into rows
            in_specs=[
                pl.BlockSpec((B_PAD, B * S), lambda i: (0, 0)),      # one-hot gather rows
                pl.BlockSpec((B * S, H), lambda i: (0, 0)),          # embeddings (B*S, H)
                pl.BlockSpec((VEC_ROWS, LANES), lambda i: (0, 0)),   # fused f32 vector slab
                pl.BlockSpec((H, W1_COLS), lambda i: (0, 0)),        # fused bf16 weight slab
                pl.BlockSpec((FF, H), lambda i: (0, 0)),             # w_fc2
            ],
            out_specs=pl.BlockSpec((B_PAD, LANES), lambda i: (0, 0)),
        ),
        # TODO(synk): at production sizes add a "parallel" grid axis (batch / query tiles) so
        # v7x's second TensorCore is used; at B=2,S=8 a single step is latency-optimal.
        compiler_params=pltpu.CompilerParams(dimension_semantics=("arbitrary",)),
    )(sel, x2d, packed["vec"], packed["w1"], packed["w2"])
    return out[:B, 0]


# --------------------------- pure-JAX reference --------------------------------
def reference_forward(input_ids, p):
    x = p["wte"][input_ids] + p["wpe"][jnp.arange(S)][None]
    h = _layernorm(x, p["ln1_g"][0], p["ln1_b"][0])
    qkv = h @ p["w_qkv"] + p["b_qkv"][0]
    q, k, v = qkv[..., :H], qkv[..., H:2 * H], qkv[..., 2 * H:]
    scores = jnp.einsum("bqd,bkd->bqk", q, k) / math.sqrt(H)
    mask = jnp.tril(jnp.ones((S, S), bool))
    scores = jnp.where(mask[None], scores, NEG_INF)
    sm = jax.nn.softmax(scores, axis=-1)
    attn = jnp.einsum("bqk,bkd->bqd", sm, v) @ p["w_o"] + p["b_o"][0]
    x = x + attn
    h2 = _layernorm(x, p["ln2_g"][0], p["ln2_b"][0])
    ff = jax.nn.gelu(h2 @ p["w_fc1"] + p["b_fc1"][0], approximate=True) @ p["w_fc2"] + p["b_fc2"][0]
    x = _layernorm(x + ff, p["lnf_g"][0], p["lnf_b"][0])
    rewards = (x @ p["v_head"])[..., 0]                                      # (B, S)
    ends = jnp.argmax((input_ids == EOS_ID).astype(jnp.float32), axis=1)     # first eos, 0 if none
    return rewards[jnp.arange(B), ends]


def init_params(key):
    ks = jax.random.split(key, 7)
    std = 0.02
    f32 = jnp.float32
    return {
        "wte":   jax.random.normal(ks[0], (V, H), f32) * std,
        "wpe":   jax.random.normal(ks[1], (S, H), f32) * std,
        "ln1_g": jnp.ones((1, H), f32),  "ln1_b": jnp.zeros((1, H), f32),
        "w_qkv": jax.random.normal(ks[2], (H, 3 * H), f32) * std,
        "b_qkv": jnp.zeros((1, 3 * H), f32),
        "w_o":   jax.random.normal(ks[3], (H, H), f32) * std,
        "b_o":   jnp.zeros((1, H), f32),
        "ln2_g": jnp.ones((1, H), f32),  "ln2_b": jnp.zeros((1, H), f32),
        "w_fc1": jax.random.normal(ks[4], (H, FF), f32) * std,
        "b_fc1": jnp.zeros((1, FF), f32),
        "w_fc2": jax.random.normal(ks[5], (FF, H), f32) * std,
        "b_fc2": jnp.zeros((1, H), f32),
        "lnf_g": jnp.ones((1, H), f32),  "lnf_b": jnp.zeros((1, H), f32),
        "v_head": jax.random.normal(ks[6], (H, 1), f32) * std,   # nn.Linear(n_embd, 1, bias=False)
    }


if __name__ == "__main__":
    key = jax.random.PRNGKey(0)
    pkey, ikey = jax.random.split(key)
    params = init_params(pkey)

    # one-time parameter packing (hoisted out of the per-call path)
    packed = jax.block_until_ready(pack_params(params))

    # token ids in [3, V); row 0 gets an EOS at position 5, row 1 has no EOS (-> index 0)
    input_ids = jax.random.randint(ikey, (B, S), 3, V, dtype=jnp.int32)
    input_ids = input_ids.at[0, 5].set(EOS_ID)

    returns = jax.block_until_ready(reward_model_forward(input_ids, packed))
    ref = reference_forward(input_ids, params)

    assert returns.shape == (B,)
    assert jnp.allclose(returns, ref, rtol=1e-2, atol=1e-2), (returns, ref)
    print("KERNEL_OK")
</pallas_src>

<mosaic_0001>
module attributes {stable_mosaic.version = 11 : i64} {
  func.func @reward_kernel(%arg0: i32, %arg1: memref<8x16xf32, #tpu.memory_space<vmem>>, %arg2: memref<16x32xf32, #tpu.memory_space<vmem>>, %arg3: memref<19x128xf32, #tpu.memory_space<vmem>>, %arg4: memref<32x384xbf16, #tpu.memory_space<vmem>>, %arg5: memref<128x32xbf16, #tpu.memory_space<vmem>>, %arg6: memref<8x128xf32, #tpu.memory_space<vmem>>) attributes {dimension_semantics = [#tpu.dimension_semantics<arbitrary>], iteration_bounds = array<i64: 1>, scalar_prefetch = 0 : i64, scratch_operands = 0 : i64, tpu.core_type = #tpu.core_type<tc>, window_params = [{pipeline_mode = #tpu.pipeline_mode<synchronous>, transform_indices = @transform_0, window_bounds = array<i64: 8, 16>}, {pipeline_mode = #tpu.pipeline_mode<synchronous>, transform_indices = @transform_1, window_bounds = array<i64: 16, 32>}, {pipeline_mode = #tpu.pipeline_mode<synchronous>, transform_indices = @transform_2, window_bounds = array<i64: 19, 128>}, {pipeline_mode = #tpu.pipeline_mode<synchronous>, transform_indices = @transform_3, window_bounds = array<i64: 32, 384>}, {pipeline_mode = #tpu.pipeline_mode<synchronous>, transform_indices = @transform_4, window_bounds = array<i64: 128, 32>}, {pipeline_mode = #tpu.pipeline_mode<synchronous>, transform_indices = @transform_5, window_bounds = array<i64: 8, 128>}]} {
    %c0 = arith.constant 0 : index
    %c0_0 = arith.constant 0 : index
    %0 = vector.load %arg2[%c0, %c0_0] : memref<16x32xf32, #tpu.memory_space<vmem>>, vector<16x32xf32>
    %c0_1 = arith.constant 0 : index
    %c0_2 = arith.constant 0 : index
    %1 = vector.load %arg3[%c0_1, %c0_2] : memref<19x128xf32, #tpu.memory_space<vmem>>, vector<19x128xf32>
    %2 = vector.extract_strided_slice %1 {offsets = [0, 0], sizes = [1, 32], strides = [1, 1]} : vector<19x128xf32> to vector<1x32xf32>
    %3 = vector.extract_strided_slice %1 {offsets = [1, 0], sizes = [1, 32], strides = [1, 1]} : vector<19x128xf32> to vector<1x32xf32>
    %4 = vector.extract_strided_slice %1 {offsets = [2, 0], sizes = [1, 32], strides = [1, 1]} : vector<19x128xf32> to vector<1x32xf32>
    %5 = vector.extract_strided_slice %1 {offsets = [3, 0], sizes = [1, 32], strides = [1, 1]} : vector<19x128xf32> to vector<1x32xf32>
    %6 = vector.extract_strided_slice %1 {offsets = [4, 0], sizes = [1, 32], strides = [1, 1]} : vector<19x128xf32> to vector<1x32xf32>
    %7 = vector.extract_strided_slice %1 {offsets = [5, 0], sizes = [1, 32], strides = [1, 1]} : vector<19x128xf32> to vector<1x32xf32>
    %8 = vector.extract_strided_slice %1 {offsets = [6, 0], sizes = [1, 96], strides = [1, 1]} : vector<19x128xf32> to vector<1x96xf32>
    %9 = vector.extract_strided_slice %1 {offsets = [7, 0], sizes = [1, 32], strides = [1, 1]} : vector<19x128xf32> to vector<1x32xf32>
    %10 = vector.extract_strided_slice %1 {offsets = [8, 0], sizes = [1, 128], strides = [1, 1]} : vector<19x128xf32> to vector<1x128xf32>
    %11 = vector.extract_strided_slice %1 {offsets = [9, 0], sizes = [1, 32], strides = [1, 1]} : vector<19x128xf32> to vector<1x32xf32>
    %12 = vector.extract_strided_slice %1 {offsets = [10, 0], sizes = [1, 32], strides = [1, 1]} : vector<19x128xf32> to vector<1x32xf32>
    %13 = vector.extract_strided_slice %1 {offsets = [11, 0], sizes = [8, 8], strides = [1, 1]} : vector<19x128xf32> to vector<8x8xf32>
    %c0_3 = arith.constant 0 : index
    %c0_4 = arith.constant 0 : index
    %14 = vector.load %arg4[%c0_3, %c0_4] : memref<32x384xbf16, #tpu.memory_space<vmem>>, vector<32x384xbf16>
    %15 = vector.extract_strided_slice %14 {offsets = [0, 0], sizes = [32, 96], strides = [1, 1]} : vector<32x384xbf16> to vector<32x96xbf16>
    %16 = vector.extract_strided_slice %14 {offsets = [0, 128], sizes = [32, 32], strides = [1, 1]} : vector<32x384xbf16> to vector<32x32xbf16>
    %17 = vector.extract_strided_slice %14 {offsets = [0, 256], sizes = [32, 128], strides = [1, 1]} : vector<32x384xbf16> to vector<32x128xbf16>
    %c0_5 = arith.constant 0 : index
    %c0_6 = arith.constant 0 : index
    %18 = vector.load %arg5[%c0_5, %c0_6] : memref<128x32xbf16, #tpu.memory_space<vmem>>, vector<128x32xbf16>
    %cst = arith.constant dense<0.000000e+00> : vector<16xf32>
    %19 = vector.multi_reduction <add>, %0, %cst [1] : vector<16x32xf32> to vector<16xf32>
    %20 = vector.shape_cast %19 : vector<16xf32> to vector<16x1xf32>
    %cst_7 = arith.constant 3.200000e+01 : f32
    %21 = vector.broadcast %cst_7 : f32 to vector<16x1xf32>
    %22 = arith.divf %20, %21 : vector<16x1xf32>
    %23 = vector.broadcast %22 : vector<16x1xf32> to vector<16x32xf32>
    %24 = arith.subf %0, %23 : vector<16x32xf32>
    %25 = arith.mulf %24, %24 : vector<16x32xf32>
    %cst_8 = arith.constant dense<0.000000e+00> : vector<16xf32>
    %26 = vector.multi_reduction <add>, %25, %cst_8 [1] : vector<16x32xf32> to vector<16xf32>
    %27 = vector.shape_cast %26 : vector<16xf32> to vector<16x1xf32>
    %cst_9 = arith.constant 3.200000e+01 : f32
    %28 = vector.broadcast %cst_9 : f32 to vector<16x1xf32>
    %29 = arith.divf %27, %28 : vector<16x1xf32>
    %30 = vector.broadcast %22 : vector<16x1xf32> to vector<16x32xf32>
    %31 = arith.subf %0, %30 : vector<16x32xf32>
    %cst_10 = arith.constant 9.99999974E-6 : f32
    %32 = vector.broadcast %cst_10 : f32 to vector<16x1xf32>
    %33 = arith.addf %29, %32 : vector<16x1xf32>
    %34 = math.rsqrt %33 : vector<16x1xf32>
    %35 = vector.broadcast %34 : vector<16x1xf32> to vector<16x32xf32>
    %36 = arith.mulf %31, %35 : vector<16x32xf32>
    %37 = vector.broadcast %2 : vector<1x32xf32> to vector<16x32xf32>
    %38 = arith.mulf %36, %37 : vector<16x32xf32>
    %39 = vector.broadcast %3 : vector<1x32xf32> to vector<16x32xf32>
    %40 = arith.addf %38, %39 : vector<16x32xf32>
    %41 = arith.truncf %40 : vector<16x32xf32> to vector<16x32xbf16>
    %cst_11 = arith.constant dense<0.000000e+00> : vector<16x96xf32>
    %42 = tpu.matmul %41, %15, %cst_11 {dimension_numbers = #tpu.dot_dimension_numbers<[1], [0], [0], [1], [0, 0, 1, 1], [], []>} : vector<16x32xbf16>, vector<32x96xbf16>, vector<16x96xf32> -> vector<16x96xf32>
    %43 = vector.broadcast %8 : vector<1x96xf32> to vector<16x96xf32>
    %44 = arith.addf %42, %43 : vector<16x96xf32>
    %45 = arith.truncf %44 : vector<16x96xf32> to vector<16x96xbf16>
    %46 = vector.extract_strided_slice %45 {offsets = [0, 0], sizes = [16, 32], strides = [1, 1]} : vector<16x96xbf16> to vector<16x32xbf16>
    %47 = vector.shape_cast %46 : vector<16x32xbf16> to vector<2x8x32xbf16>
    %48 = vector.extract_strided_slice %45 {offsets = [0, 32], sizes = [16, 32], strides = [1, 1]} : vector<16x96xbf16> to vector<16x32xbf16>
    %49 = vector.shape_cast %48 : vector<16x32xbf16> to vector<2x8x32xbf16>
    %50 = vector.extract_strided_slice %45 {offsets = [0, 64], sizes = [16, 32], strides = [1, 1]} : vector<16x96xbf16> to vector<16x32xbf16>
    %51 = vector.shape_cast %50 : vector<16x32xbf16> to vector<2x8x32xbf16>
    "tpu.trace_start"() <{level = 10 : i32, message = "bqd,bkd->bqk"}> : () -> ()
    %cst_12 = arith.constant dense<0.000000e+00> : vector<2x8x8xf32>
    %52 = tpu.matmul %47, %49, %cst_12 {dimension_numbers = #tpu.dot_dimension_numbers<[2], [2], [1], [1], [0, 0, 0, 1, 1, 1], [0], [0]>} : vector<2x8x32xbf16>, vector<2x8x32xbf16>, vector<2x8x8xf32> -> vector<2x8x8xf32>
    "tpu.trace_stop"() : () -> ()
    %53 = vector.shape_cast %13 : vector<8x8xf32> to vector<1x8x8xf32>
    %54 = vector.broadcast %53 : vector<1x8x8xf32> to vector<2x8x8xf32>
    %55 = arith.addf %52, %54 : vector<2x8x8xf32>
    %cst_13 = arith.constant dense<0xFF800000> : vector<2x8xf32>
    %56 = vector.multi_reduction <maximumf>, %55, %cst_13 [2] : vector<2x8x8xf32> to vector<2x8xf32>
    %57 = vector.shape_cast %56 : vector<2x8xf32> to vector<2x8x1xf32>
    %58 = vector.broadcast %57 : vector<2x8x1xf32> to vector<2x8x8xf32>
    %59 = arith.subf %55, %58 : vector<2x8x8xf32>
    %60 = math.exp %59 : vector<2x8x8xf32>
    %cst_14 = arith.constant dense<0.000000e+00> : vector<2x8xf32>
    %61 = vector.multi_reduction <add>, %60, %cst_14 [2] : vector<2x8x8xf32> to vector<2x8xf32>
    %62 = vector.shape_cast %61 : vector<2x8xf32> to vector<2x8x1xf32>
    %63 = tpu.reciprocal %62 {approx = true} : vector<2x8x1xf32> -> vector<2x8x1xf32>
    %64 = vector.broadcast %63 : vector<2x8x1xf32> to vector<2x8x8xf32>
    %65 = arith.mulf %60, %64 : vector<2x8x8xf32>
    %66 = arith.truncf %65 : vector<2x8x8xf32> to vector<2x8x8xbf16>
    "tpu.trace_start"() <{level = 10 : i32, message = "bqk,bkd->bqd"}> : () -> ()
    %cst_15 = arith.constant dense<0.000000e+00> : vector<2x8x32xf32>
    %67 = tpu.matmul %66, %51, %cst_15 {dimension_numbers = #tpu.dot_dimension_numbers<[2], [1], [1], [2], [0, 0, 0, 1, 1, 2], [0], [0]>} : vector<2x8x8xbf16>, vector<2x8x32xbf16>, vector<2x8x32xf32> -> vector<2x8x32xf32>
    "tpu.trace_stop"() : () -> ()
    %68 = vector.shape_cast %67 : vector<2x8x32xf32> to vector<16x32xf32>
    %69 = arith.truncf %68 : vector<16x32xf32> to vector<16x32xbf16>
    %cst_16 = arith.constant dense<0.000000e+00> : vector<16x32xf32>
    %70 = tpu.matmul %69, %16, %cst_16 {dimension_numbers = #tpu.dot_dimension_numbers<[1], [0], [0], [1], [0, 0, 1, 1], [], []>} : vector<16x32xbf16>, vector<32x32xbf16>, vector<16x32xf32> -> vector<16x32xf32>
    %71 = vector.broadcast %9 : vector<1x32xf32> to vector<16x32xf32>
    %72 = arith.addf %70, %71 : vector<16x32xf32>
    %73 = arith.addf %0, %72 : vector<16x32xf32>
    %cst_17 = arith.constant dense<0.000000e+00> : vector<16xf32>
    %74 = vector.multi_reduction <add>, %73, %cst_17 [1] : vector<16x32xf32> to vector<16xf32>
    %75 = vector.shape_cast %74 : vector<16xf32> to vector<16x1xf32>
    %cst_18 = arith.constant 3.200000e+01 : f32
    %76 = vector.broadcast %cst_18 : f32 to vector<16x1xf32>
    %77 = arith.divf %75, %76 : vector<16x1xf32>
    %78 = vector.broadcast %77 : vector<16x1xf32> to vector<16x32xf32>
    %79 = arith.subf %73, %78 : vector<16x32xf32>
    %80 = arith.mulf %79, %79 : vector<16x32xf32>
    %cst_19 = arith.constant dense<0.000000e+00> : vector<16xf32>
    %81 = vector.multi_reduction <add>, %80, %cst_19 [1] : vector<16x32xf32> to vector<16xf32>
    %82 = vector.shape_cast %81 : vector<16xf32> to vector<16x1xf32>
    %cst_20 = arith.constant 3.200000e+01 : f32
    %83 = vector.broadcast %cst_20 : f32 to vector<16x1xf32>
    %84 = arith.divf %82, %83 : vector<16x1xf32>
    %85 = vector.broadcast %77 : vector<16x1xf32> to vector<16x32xf32>
    %86 = arith.subf %73, %85 : vector<16x32xf32>
    %cst_21 = arith.constant 9.99999974E-6 : f32
    %87 = vector.broadcast %cst_21 : f32 to vector<16x1xf32>
    %88 = arith.addf %84, %87 : vector<16x1xf32>
    %89 = math.rsqrt %88 : vector<16x1xf32>
    %90 = vector.broadcast %89 : vector<16x1xf32> to vector<16x32xf32>
    %91 = arith.mulf %86, %90 : vector<16x32xf32>
    %92 = vector.broadcast %4 : vector<1x32xf32> to vector<16x32xf32>
    %93 = arith.mulf %91, %92 : vector<16x32xf32>
    %94 = vector.broadcast %5 : vector<1x32xf32> to vector<16x32xf32>
    %95 = arith.addf %93, %94 : vector<16x32xf32>
    %96 = arith.truncf %95 : vector<16x32xf32> to vector<16x32xbf16>
    %cst_22 = arith.constant dense<0.000000e+00> : vector<16x128xf32>
    %97 = tpu.matmul %96, %17, %cst_22 {dimension_numbers = #tpu.dot_dimension_numbers<[1], [0], [0], [1], [0, 0, 1, 1], [], []>} : vector<16x32xbf16>, vector<32x128xbf16>, vector<16x128xf32> -> vector<16x128xf32>
    %98 = vector.broadcast %10 : vector<1x128xf32> to vector<16x128xf32>
    %99 = arith.addf %97, %98 : vector<16x128xf32>
    %100 = arith.mulf %99, %99 : vector<16x128xf32>
    %101 = arith.mulf %99, %100 : vector<16x128xf32>
    %cst_23 = arith.constant 4.471500e-02 : f32
    %102 = vector.broadcast %cst_23 : f32 to vector<16x128xf32>
    %103 = arith.mulf %102, %101 : vector<16x128xf32>
    %104 = arith.addf %99, %103 : vector<16x128xf32>
    %cst_24 = arith.constant 0.797884583 : f32
    %105 = vector.broadcast %cst_24 : f32 to vector<16x128xf32>
    %106 = arith.mulf %105, %104 : vector<16x128xf32>
    %107 = math.tanh %106 : vector<16x128xf32>
    %cst_25 = arith.constant 1.000000e+00 : f32
    %108 = vector.broadcast %cst_25 : f32 to vector<16x128xf32>
    %109 = arith.addf %108, %107 : vector<16x128xf32>
    %cst_26 = arith.constant 5.000000e-01 : f32
    %110 = vector.broadcast %cst_26 : f32 to vector<16x128xf32>
    %111 = arith.mulf %110, %109 : vector<16x128xf32>
    %112 = arith.mulf %99, %111 : vector<16x128xf32>
    %113 = arith.truncf %112 : vector<16x128xf32> to vector<16x128xbf16>
    %cst_27 = arith.constant dense<0.000000e+00> : vector<16x32xf32>
    %114 = tpu.matmul %113, %18, %cst_27 {dimension_numbers = #tpu.dot_dimension_numbers<[1], [0], [0], [1], [0, 0, 1, 1], [], []>} : vector<16x128xbf16>, vector<128x32xbf16>, vector<16x32xf32> -> vector<16x32xf32>
    %115 = vector.broadcast %11 : vector<1x32xf32> to vector<16x32xf32>
    %116 = arith.addf %114, %115 : vector<16x32xf32>
    %117 = arith.addf %73, %116 : vector<16x32xf32>
    %c0_28 = arith.constant 0 : index
    %c0_29 = arith.constant 0 : index
    %118 = vector.load %arg1[%c0_28, %c0_29] : memref<8x16xf32, #tpu.memory_space<vmem>>, vector<8x16xf32>
    %cst_30 = arith.constant dense<0.000000e+00> : vector<8x32xf32>
    %119 = tpu.matmul %118, %117, %cst_30 {dimension_numbers = #tpu.dot_dimension_numbers<[1], [0], [0], [1], [0, 0, 1, 1], [], []>} : vector<8x16xf32>, vector<16x32xf32>, vector<8x32xf32> -> vector<8x32xf32>
    %cst_31 = arith.constant dense<0.000000e+00> : vector<8xf32>
    %120 = vector.multi_reduction <add>, %119, %cst_31 [1] : vector<8x32xf32> to vector<8xf32>
    %121 = vector.shape_cast %120 : vector<8xf32> to vector<8x1xf32>
    %cst_32 = arith.constant 3.200000e+01 : f32
    %122 = vector.broadcast %cst_32 : f32 to vector<8x1xf32>
    %123 = arith.divf %121, %122 : vector<8x1xf32>
    %124 = vector.broadcast %123 : vector<8x1xf32> to vector<8x32xf32>
    %125 = arith.subf %119, %124 : vector<8x32xf32>
    %126 = arith.mulf %125, %125 : vector<8x32xf32>
    %cst_33 = arith.constant dense<0.000000e+00> : vector<8xf32>
    %127 = vector.multi_reduction <add>, %126, %cst_33 [1] : vector<8x32xf32> to vector<8xf32>
    %128 = vector.shape_cast %127 : vector<8xf32> to vector<8x1xf32>
    %cst_34 = arith.constant 3.200000e+01 : f32
    %129 = vector.broadcast %cst_34 : f32 to vector<8x1xf32>
    %130 = arith.divf %128, %129 : vector<8x1xf32>
    %131 = vector.broadcast %123 : vector<8x1xf32> to vector<8x32xf32>
    %132 = arith.subf %119, %131 : vector<8x32xf32>
    %cst_35 = arith.constant 9.99999974E-6 : f32
    %133 = vector.broadcast %cst_35 : f32 to vector<8x1xf32>
    %134 = arith.addf %130, %133 : vector<8x1xf32>
    %135 = math.rsqrt %134 : vector<8x1xf32>
    %136 = vector.broadcast %135 : vector<8x1xf32> to vector<8x32xf32>
    %137 = arith.mulf %132, %136 : vector<8x32xf32>
    %138 = vector.broadcast %6 : vector<1x32xf32> to vector<8x32xf32>
    %139 = arith.mulf %137, %138 : vector<8x32xf32>
    %140 = vector.broadcast %7 : vector<1x32xf32> to vector<8x32xf32>
    %141 = arith.addf %139, %140 : vector<8x32xf32>
    %142 = vector.broadcast %12 : vector<1x32xf32> to vector<8x32xf32>
    %143 = arith.mulf %141, %142 : vector<8x32xf32>
    %cst_36 = arith.constant dense<0.000000e+00> : vector<8xf32>
    %144 = vector.multi_reduction <add>, %143, %cst_36 [1] : vector<8x32xf32> to vector<8xf32>
    %145 = vector.shape_cast %144 : vector<8xf32> to vector<8x1xf32>
    %146 = vector.shape_cast %145 : vector<8x1xf32> to vector<8x1xf32>
    %147 = vector.broadcast %146 : vector<8x1xf32> to vector<8x128xf32>
    %c0_37 = arith.constant 0 : index
    %c0_38 = arith.constant 0 : index
    %148 = vector.load %arg6[%c0_37, %c0_38] : memref<8x128xf32, #tpu.memory_space<vmem>>, vector<8x128xf32>
    tpu.vector_store %arg6[%c0_37, %c0_38], %147 {strides = array<i32>} : memref<8x128xf32, #tpu.memory_space<vmem>>, vector<8x128xf32>,
    return
  }
  func.func @transform_0(%arg0: i32) -> (i32, i32) {
    %c0_i32 = arith.constant 0 : i32
    %c0_i32_0 = arith.constant 0 : i32
    %c0_i32_1 = arith.constant 0 : i32
    return %c0_i32, %c0_i32_0 : i32, i32
  }
  func.func @transform_1(%arg0: i32) -> (i32, i32) {
    %c0_i32 = arith.constant 0 : i32
    %c0_i32_0 = arith.constant 0 : i32
    %c0_i32_1 = arith.constant 0 : i32
    return %c0_i32, %c0_i32_0 : i32, i32
  }
  func.func @transform_2(%arg0: i32) -> (i32, i32) {
    %c0_i32 = arith.constant 0 : i32
    %c0_i32_0 = arith.constant 0 : i32
    %c0_i32_1 = arith.constant 0 : i32
    return %c0_i32, %c0_i32_0 : i32, i32
  }
  func.func @transform_3(%arg0: i32) -> (i32, i32) {
    %c0_i32 = arith.constant 0 : i32
    %c0_i32_0 = arith.constant 0 : i32
    %c0_i32_1 = arith.constant 0 : i32
    return %c0_i32, %c0_i32_0 : i32, i32
  }
  func.func @transform_4(%arg0: i32) -> (i32, i32) {
    %c0_i32 = arith.constant 0 : i32
    %c0_i32_0 = arith.constant 0 : i32
    %c0_i32_1 = arith.constant 0 : i32
    return %c0_i32, %c0_i32_0 : i32, i32
  }
  func.func @transform_5(%arg0: i32) -> (i32, i32) {
    %c0_i32 = arith.constant 0 : i32
    %c0_i32_0 = arith.constant 0 : i32
    %c0_i32_1 = arith.constant 0 : i32
    return %c0_i32, %c0_i32_0 : i32, i32
  }
}

</mosaic_0001>

<bundles_post_ra>
// kernel: reward_model_forward.1
= control target key start
LH: loop header
LB: loop body
LE: loop exit
PB: predicated region body
PF: predicated region fallthrough
CT: control target
= control target key end

     0   :  { %vm50_vm0 = vcmask 261120   ;;  %v941_v15 = vmov 0.0   ;;  %vm942_vm1 = vmmov 0   ;;  %v78_v21 = vlaneseq  ;;  %s943_s27 = smov 96   ;;  %s1157_s1 = inlined_call_operand.vmem [shape: f32[16,32], index: 1, kind: input, shape index: {}]   ;;  %s1158_s3 = inlined_call_operand.vmem [shape: bf16[32,384], index: 3, kind: input, shape index: {}]   ;;  %s1159_s2 = inlined_call_operand.vmem [shape: f32[19,128], index: 2, kind: input, shape index: {}]   ;;  %s1160_s4 = inlined_call_operand.vmem [shape: bf16[128,32], index: 4, kind: input, shape index: {}]   ;;  %s1161_s0 = inlined_call_operand.vmem [shape: f32[8,16], index: 0, kind: input, shape index: {}]   ;;  %s1162_s5 = inlined_call_operand.vmem [shape: f32[8,128], index: 5, kind: output, shape index: {}]  }
   0x1   :  { %v979_v0 = vld [vmem:[%s1157_s1] sm:$0xff]  ;;  %v984_v1 = vld [vmem:[%s1157_s1 + $0x8] sm:$0xff]  ;;  %820 = vmatprep.subr.bf16.mxu0 %v941_v15  ;;  %840 = vmatprep.subr.bf16.mxu1 %v941_v15  ;;  %v25_v54 = vld [vmem:[%s1159_s2 + $0x10] sm:$0x7]  ;;  %vm161_vm2 = vcmask 1044480   ;;  %vm260_vm3 = vcmask 64512  }
   0x2   :  { %v51_v2 = vsel %vm50_vm0, %v979_v0, 0.0  ;;  %v54_v3 = vsel %vm50_vm0, %v984_v1, 0.0  ;;  %v903_v14 = vld [vmem:[%s1158_s3] ss:$12 sps:$4 sm:$0xff]   ;;  %v906_v16 = vld [vmem:[%s1158_s3 + $0x18] ss:$12 sps:$4 sm:$0xff]   ;;  %824 = vmatprep.mubr.msk.bf16.mxu0 %vm942_vm1, %v941_v15  ;;  %842 = vmatprep.mubr.msk.bf16.mxu1 %vm942_vm1, %v941_v15 }
   0x3   :  { %52 = vadd.xlane.f32.xlu0 %v51_v2  ;;  %821 = vmatpush3.bf16.msra.mxu0 %v903_v14  ;;  %v1008_v24 = vshrl.u32 %v78_v21, 7  ;;  %v1014_v26 = vld [vmem:[%s1159_s2] sm:$0xff]  ;;  %v1041_v53 = vld [vmem:[%s1159_s2 + $0x8] sm:$0xff]  ;;  %v163_v56 = vrot.slane %v25_v54, 3  ;;  %s944_s2 = smov 64   ;;  %vm290_vm4 = vcmask 1043456  }
   0x4   :  { %822 = vmatprep.subr.bf16.mxu0 %v941_v15  ;;  %v162_v55 = vrot.slane %v1041_v53, 3  ;;  %vm655_vm5 = vcmask 130048  }
   0x5   :  { %v80_v25 = vsub.s32 0, %v1008_v24  ;;  %v86_v30 = vsub.s32 1, %v1008_v24  ;;  %v93_v39 = vsub.s32 6, %v1008_v24 }
   0x6   :  { %v164_v57 = vsel %vm161_vm2, %v162_v55, %v163_v56 }
   0x7   :  { %55 = vadd.xlane.f32.xlu0 %v54_v3  ;;  %823 = vmatpush3.bf16.msra.mxu0 %v906_v16  ;;  %v81_v29 = vrot.slane %v1014_v26, %v80_v25  ;;  %v87_v34 = vrot.slane %v1014_v26, %v86_v30  ;;  %v94_v40 = vrot.slane %v1014_v26, %v93_v39 }
   0x8   :  { %828 = vmatprep.subr.bf16.mxu0 %v941_v15 }
  0x90   :  { %v53_v4 = vpop.xlane.xlu0 %52 }
  0x91   :  { %v58_v5 = vmul.f32 0.03125, %v53_v4 }
  0x93   :  { %v60_v6 = vsub.f32 %v979_v0, %v58_v5 }
  0x94   :  { %v56_v7 = vpop.xlane.xlu0 %55 }
  0x95   :  { %v59_v8 = vmul.f32 0.03125, %v56_v7  ;;  %v62_v9 = vmul.f32 %v60_v6, %v60_v6 }
  0x97   :  { %v61_v10 = vsub.f32 %v984_v1, %v59_v8  ;;  %v64_v11 = vsel %vm50_vm0, %v62_v9, 0.0 }
  0x98   :  { %65 = vadd.xlane.f32.xlu1 %v64_v11 }
  0x99   :  { %v63_v12 = vmul.f32 %v61_v10, %v61_v10 }
  0x9b   :  { %v67_v13 = vsel %vm50_vm0, %v63_v12, 0.0 }
  0x9c   :  { %68 = vadd.xlane.f32.xlu1 %v67_v13 }
 0x125   :  { %v66_v17 = vpop.xlane.xlu1 %65 }
 0x126   :  { %v70_v18 = vmul.f32 0.03125, %v66_v17 }
 0x128   :  { %v72_v19 = vadd.f32 1e-05, %v70_v18 }
 0x129   :  { %v69_v20 = vpop.xlane.xlu1 %68 }
 0x12a   :  { %919 = vrsqrt.f32 %v72_v19  ;;  %v71_v22 = vmul.f32 0.03125, %v69_v20 }
 0x12c   :  { %v73_v23 = vadd.f32 1e-05, %v71_v22 }
 0x12e   :  { %921 = vrsqrt.f32 %v73_v23 }
 0x134   :  { %v920_v27 = vpop.eup %919 }
 0x135   :  { %v76_v28 = vmul.f32 %v920_v27, %v60_v6 }
 0x137   :  { %v82_v33 = vmul.f32 %v81_v29, %v76_v28 }
 0x138   :  { %v922_v31 = vpop.eup %921 }
 0x139   :  { %v77_v32 = vmul.f32 %v922_v31, %v61_v10  ;;  %v88_v36 = vadd.f32 %v87_v34, %v82_v33  ;;  %v908_v33 = vld [vmem:[%s1158_s3 + $0x1c] ss:$12 sps:$4 sm:$0xff]  }
 0x13b   :  { %v83_v35 = vmul.f32 %v81_v29, %v77_v32  ;;  %v905_v29 = vld [vmem:[%s1158_s3 + $0x4] ss:$12 sps:$4 sm:$0xff]  }
 0x13d   :  { %v89_v37 = vadd.f32 %v87_v34, %v83_v35 }
 0x13f   :  { %v90_v38 = vpack.c.bf16 %v89_v37, %v88_v36 }
 0x141   :  { %825 = vmatmul.mubr.msk.bf16.vlgmr.msra.gmra.mrb[0].mxu0 %vm50_vm0, %v90_v38 }
 0x142   :  { %830 = vmatprep.mubr.msk.bf16.mxu0 %vm942_vm1, %v941_v15 }
 0x214   :  { %v144_v41 = vpop.f32.mrb[0].mxu0 }
 0x215   :  { %v145_v42 = vadd.f32 %v144_v41, %v94_v40  ;;  %v826_v43 = vpop.f32.mrb[1].mxu0 }
 0x216   :  { %v147_v44 = vpop.f32.mrb[2].mxu0 }
 0x217   :  { %v789_v45 = vpack.c.bf16 %v145_v42, %v145_v42  ;;  %v148_v46 = vadd.f32 %v147_v44, %v94_v40  ;;  %v827_v47 = vpop.f32.mrb[3].mxu0 }
 0x219   :  { %v790_v48 = vpack.c.bf16 %v148_v46, %v148_v46  ;;  %157 = vrot.lane.b32.xlu0 %v789_v45, %s943_s27  ;;  %v385_v46 = vsub.s32 7, %v1008_v24 }
 0x21b   :  { %212 = vrot.lane.b32.xlu1 %v790_v48, %s943_s27  ;;  %v386_v47 = vrot.slane %v1014_v26, %v385_v46 }
 0x28b   :  { %v158_v49 = vpop.permute.xlu0 %157 }
 0x28c   :  { %v170_v50 = vsel %vm50_vm0, %v158_v49, 0 }
 0x28d   :  { %829 = vmatpush3.bf16.xpose.msra.mxu0 %v170_v50  ;;  %v213_v51 = vpop.permute.xlu1 %212 }
 0x28e   :  { %834 = vmatprep.subr.bf16.mxu0 %v941_v15  ;;  %v218_v52 = vsel %vm50_vm0, %v213_v51, 0 }
 0x294   :  { %831 = vmatmul.mubr.msk.bf16.vlgmr.msra.gmra.mrb[4].mxu0 %vm50_vm0, %v789_v45 }
 0x295   :  { %835 = vmatpush3.bf16.xpose.msra.mxu0 %v218_v52  ;;  %836 = vmatprep.mubr.msk.bf16.mxu0 %vm942_vm1, %v941_v15 }
 0x296   :  { %846 = vmatprep.subr.bf16.mxu0 %v941_v15 }
 0x29c   :  { %837 = vmatmul.mubr.msk.bf16.vlgmr.msra.gmra.mrb[8].mxu0 %vm50_vm0, %v790_v48 }
 0x29d   :  { %848 = vmatprep.mubr.msk.bf16.mxu0 %vm942_vm1, %v941_v15 }
 0x367   :  { %v206_v58 = vpop.f32.mrb[4].mxu0 }
 0x368   :  { %v207_v59 = vadd.f32 %v206_v58, %v164_v57  ;;  %v832_v60 = vpop.f32.mrb[5].mxu0 }
 0x369   :  { %v209_v61 = vpop.f32.mrb[6].mxu0 }
 0x36a   :  { %v833_v62 = vpop.f32.mrb[7].mxu0  ;;  %v261_v63 = vsel %vm260_vm3, %v207_v59, -inf }
 0x36b   :  { %262 = vmax.xlane.f32.xlu1 %v261_v63 }
 0x36f   :  { %v254_v2 = vpop.f32.mrb[8].mxu0 }
 0x370   :  { %v255_v3 = vadd.f32 %v254_v2, %v164_v57  ;;  %v838_v4 = vpop.f32.mrb[9].mxu0 }
 0x371   :  { %v257_v5 = vpop.f32.mrb[10].mxu0 }
 0x372   :  { %v839_v6 = vpop.f32.mrb[11].mxu0  ;;  %v264_v7 = vsel %vm260_vm3, %v255_v3, -inf  ;;  %v909_v5 = vld [vmem:[%s1158_s3 + $0x8] ss:$12 sps:$4 sm:$0xff]  }
 0x373   :  { %265 = vmax.xlane.f32.xlu0 %v264_v7  ;;  %v910_v6 = vld [vmem:[%s1158_s3 + $0x20] ss:$12 sps:$4 sm:$0xff]  }
 0x3f8   :  { %v263_v8 = vpop.xlane.xlu1 %262 }
 0x3f9   :  { %v267_v9 = vsub.f32 %v207_v59, %v263_v8 }
 0x3fb   :  { %v269_v10 = vmul.f32 1.442695, %v267_v9 }
 0x3fd   :  { %923 = vpow2.f32 %v269_v10 }
 0x400   :  { %v266_v11 = vpop.xlane.xlu0 %265 }
 0x401   :  { %v268_v12 = vsub.f32 %v255_v3, %v266_v11 }
 0x403   :  { %v271_v13 = vmul.f32 1.442695, %v268_v12 }
 0x405   :  { %925 = vpow2.f32 %v271_v13  ;;  %v469_v13 = vsub.s32 2, %v1008_v24 }
 0x407   :  { %v924_v14 = vpop.eup %923 }
 0x408   :  { %v273_v16 = vsel %vm260_vm3, %v924_v14, 0.0 }
 0x409   :  { %274 = vadd.xlane.f32.xlu0 %v273_v16  ;;  %v475_v16 = vsub.s32 3, %v1008_v24 }
 0x40f   :  { %v926_v17 = vpop.eup %925 }
 0x410   :  { %v276_v18 = vsel %vm260_vm3, %v926_v17, 0.0 }
 0x411   :  { %277 = vadd.xlane.f32.xlu1 %v276_v18 }
 0x41f   :  { %285 = vrot.lane.b32.xlu0 %v789_v45, %s944_s2 }
 0x422   :  { %334 = vrot.lane.b32.xlu1 %v790_v48, %s944_s2 }
 0x496   :  { %v275_v19 = vpop.xlane.xlu0 %274 }
 0x497   :  { %927 = vrcp.f32 %v275_v19 }
 0x49a   :  { %v286_v20 = vpop.permute.xlu0 %285 }
 0x49b   :  { %v292_v21 = vsel %vm290_vm4, %v286_v20, 0 }
 0x49c   :  { %841 = vmatpush3.bf16.msra.mxu1 %v292_v21 }
 0x49d   :  { %852 = vmatprep.subr.bf16.mxu1 %v941_v15 }
 0x49e   :  { %v278_v22 = vpop.xlane.xlu1 %277 }
 0x49f   :  { %929 = vrcp.f32 %v278_v22  ;;  %v476_v22 = vrot.slane %v1014_v26, %v475_v16 }
 0x4a1   :  { %v928_v23 = vpop.eup %927 }
 0x4a2   :  { %v335_v27 = vpop.permute.xlu1 %334  ;;  %v281_v28 = vmul.f32 %v928_v23, %v924_v14  ;;  %v470_v14 = vrot.slane %v1014_v26, %v469_v13 }
 0x4a3   :  { %v340_v31 = vsel %vm290_vm4, %v335_v27, 0 }
 0x4a4   :  { %847 = vmatpush3.bf16.msra.mxu0 %v340_v31  ;;  %v283_v32 = vpack.c.bf16 %v281_v28, %v281_v28  ;;  %v911_v31 = vld [vmem:[%s1160_s4] sm:$0xff]  }
 0x4a5   :  { %860 = vmatprep.subr.bf16.mxu0 %v941_v15 }
 0x4a6   :  { %843 = vmatmul.mubr.msk.bf16.vlgmr.msra.gmra.mrb[0].mxu1 %vm260_vm3, %v283_v32  ;;  %v912_v32 = vld [vmem:[%s1160_s4 + $0x8] sm:$0xff]  }
 0x4a7   :  { %853 = vmatpush3.bf16.msra.mxu1 %v905_v29  ;;  %856 = vmatprep.mubr.msk.bf16.mxu1 %vm942_vm1, %v941_v15 }
 0x4a8   :  { %854 = vmatprep.subr.bf16.mxu1 %v941_v15 }
 0x4a9   :  { %v930_v34 = vpop.eup %929 }
 0x4aa   :  { %v282_v35 = vmul.f32 %v930_v34, %v926_v17  ;;  %v914_v34 = vld [vmem:[%s1160_s4 + $0x18] sm:$0xff]  }
 0x4ab   :  { %855 = vmatpush3.bf16.msra.mxu1 %v908_v33  ;;  %v913_v33 = vld [vmem:[%s1160_s4 + $0x10] sm:$0xff]  }
 0x4ac   :  { %v284_v36 = vpack.c.bf16 %v282_v35, %v282_v35  ;;  %868 = vmatprep.subr.bf16.mxu1 %v941_v15  ;;  %v915_v35 = vld [vmem:[%s1160_s4 + $0x20] sm:$0xff]  }
 0x4ae   :  { %849 = vmatmul.mubr.msk.bf16.vlgmr.msra.gmra.mrb[12].mxu0 %vm260_vm3, %v284_v36  ;;  %v916_v36 = vld [vmem:[%s1160_s4 + $0x28] sm:$0xff]  }
 0x4af   :  { %864 = vmatprep.mubr.msk.bf16.mxu0 %vm942_vm1, %v941_v15  ;;  %861 = vmatpush3.bf16.msra.mxu0 %v909_v5 }
 0x4b0   :  { %862 = vmatprep.subr.bf16.mxu0 %v941_v15 }
 0x4b3   :  { %863 = vmatpush3.bf16.msra.mxu0 %v910_v6 }
 0x579   :  { %v328_v37 = vpop.f32.mrb[0].mxu1 }
 0x57a   :  { %v844_v38 = vpop.f32.mrb[1].mxu1 }
 0x57b   :  { %v331_v39 = vpop.f32.mrb[2].mxu1  ;;  %v918_v38 = vld [vmem:[%s1160_s4 + $0x38] sm:$0xff]  }
 0x57c   :  { %v845_v40 = vpop.f32.mrb[3].mxu1  ;;  %v483_v39 = vrot.slane %v1041_v53, %v80_v25 }
 0x581   :  { %v376_v41 = vpop.f32.mrb[12].mxu0 }
 0x582   :  { %v382_v42 = vpack.c.bf16 %v376_v41, %v328_v37  ;;  %v850_v43 = vpop.f32.mrb[13].mxu0  ;;  %v917_v37 = vld [vmem:[%s1160_s4 + $0x30] sm:$0xff]  }
 0x583   :  { %v379_v44 = vpop.f32.mrb[14].mxu0 }
 0x584   :  { %v851_v45 = vpop.f32.mrb[15].mxu0  ;;  %857 = vmatmul.mubr.msk.bf16.vlgmr.msra.gmra.mrb[4].mxu1 %vm50_vm0, %v382_v42 }
 0x585   :  { %884 = vmatprep.mubr.msk.bf16.mxu1 %vm942_vm1, %v941_v15  ;;  %869 = vmatpush3.bf16.msra.mxu1 %v911_v31 }
 0x586   :  { %870 = vmatprep.subr.bf16.mxu1 %v941_v15 }
 0x589   :  { %871 = vmatpush3.bf16.msra.mxu1 %v912_v32 }
 0x58a   :  { %872 = vmatprep.subr.bf16.mxu1 %v941_v15 }
 0x58d   :  { %873 = vmatpush3.bf16.msra.mxu1 %v913_v33 }
 0x58e   :  { %874 = vmatprep.subr.bf16.mxu1 %v941_v15 }
 0x591   :  { %875 = vmatpush3.bf16.msra.mxu1 %v914_v34 }
 0x592   :  { %876 = vmatprep.subr.bf16.mxu1 %v941_v15 }
 0x595   :  { %877 = vmatpush3.bf16.msra.mxu1 %v915_v35  ;;  %v755_v35 = vrot.slane %v1041_v53, %v469_v13 }
 0x596   :  { %878 = vmatprep.subr.bf16.mxu1 %v941_v15 }
 0x599   :  { %879 = vmatpush3.bf16.msra.mxu1 %v916_v36 }
 0x59a   :  { %880 = vmatprep.subr.bf16.mxu1 %v941_v15 }
 0x59d   :  { %881 = vmatpush3.bf16.msra.mxu1 %v917_v37 }
 0x59e   :  { %882 = vmatprep.subr.bf16.mxu1 %v941_v15 }
 0x5a1   :  { %883 = vmatpush3.bf16.msra.mxu1 %v918_v38 }
 0x657   :  { %v432_v48 = vpop.f32.mrb[4].mxu1 }
 0x658   :  { %v433_v49 = vadd.f32 %v432_v48, %v386_v47  ;;  %v858_v50 = vpop.f32.mrb[5].mxu1 }
 0x659   :  { %v435_v51 = vpop.f32.mrb[6].mxu1 }
 0x65a   :  { %v1073_v52 = vadd.f32 %v433_v49, %v979_v0  ;;  %v436_v54 = vadd.f32 %v435_v51, %v386_v47  ;;  %v859_v55 = vpop.f32.mrb[7].mxu1 }
 0x65c   :  { %v1076_v56 = vadd.f32 %v436_v54, %v984_v1  ;;  %v441_v57 = vsel %vm50_vm0, %v1073_v52, 0.0 }
 0x65d   :  { %442 = vadd.xlane.f32.xlu1 %v441_v57 }
 0x65e   :  { %v444_v58 = vsel %vm50_vm0, %v1076_v56, 0.0 }
 0x65f   :  { %445 = vadd.xlane.f32.xlu0 %v444_v58 }
 0x6ea   :  { %v443_v59 = vpop.xlane.xlu1 %442 }
 0x6eb   :  { %v447_v60 = vmul.f32 0.03125, %v443_v59 }
 0x6ec   :  { %v446_v61 = vpop.xlane.xlu0 %445 }
 0x6ed   :  { %v449_v62 = vsub.f32 %v1073_v52, %v447_v60  ;;  %v448_v0 = vmul.f32 0.03125, %v446_v61 }
 0x6ef   :  { %v450_v63 = vsub.f32 %v1076_v56, %v448_v0  ;;  %v451_v2 = vmul.f32 %v449_v62, %v449_v62 }
 0x6f1   :  { %v453_v1 = vsel %vm50_vm0, %v451_v2, 0.0  ;;  %v452_v3 = vmul.f32 %v450_v63, %v450_v63 }
 0x6f2   :  { %454 = vadd.xlane.f32.xlu0 %v453_v1  ;;  %v945_v1 = vmov 0.0|0.0  }
 0x6f3   :  { %v456_v4 = vsel %vm50_vm0, %v452_v3, 0.0  ;;  %895 = vmatprep.subr.bf16.mxu0 %v945_v1  ;;  %v562_v3 = vrot.slane %v1041_v53, %v86_v30 }
 0x6f4   :  { %457 = vadd.xlane.f32.xlu1 %v456_v4 }
 0x77f   :  { %v455_v7 = vpop.xlane.xlu0 %454 }
 0x780   :  { %v459_v8 = vmul.f32 0.03125, %v455_v7 }
 0x781   :  { %v458_v9 = vpop.xlane.xlu1 %457 }
 0x782   :  { %v461_v10 = vadd.f32 1e-05, %v459_v8  ;;  %v460_v11 = vmul.f32 0.03125, %v458_v9 }
 0x784   :  { %931 = vrsqrt.f32 %v461_v10  ;;  %v462_v12 = vadd.f32 1e-05, %v460_v11 }
 0x786   :  { %933 = vrsqrt.f32 %v462_v12 }
 0x78e   :  { %v932_v17 = vpop.eup %931 }
 0x78f   :  { %v465_v18 = vmul.f32 %v932_v17, %v449_v62 }
 0x790   :  { %v934_v19 = vpop.eup %933 }
 0x791   :  { %v471_v20 = vmul.f32 %v470_v14, %v465_v18  ;;  %v466_v21 = vmul.f32 %v934_v19, %v450_v63 }
 0x793   :  { %v472_v23 = vmul.f32 %v470_v14, %v466_v21  ;;  %v477_v27 = vadd.f32 %v476_v22, %v471_v20  ;;  %v654_v14 = vld [vmem:[%s1161_s0] sm:$0xff] }
 0x795   :  { %v478_v28 = vadd.f32 %v476_v22, %v472_v23 }
 0x797   :  { %v479_v29 = vpack.c.bf16 %v478_v28, %v477_v27  ;;  %v744_v27 = vsub.s32 4, %v1008_v24  ;;  %v749_v28 = vsub.s32 5, %v1008_v24 }
 0x799   :  { %865 = vmatmul.mubr.msk.bf16.vlgmr.msra.gmra.mrb[16].mxu0 %vm50_vm0, %v479_v29  ;;  %v745_v29 = vrot.slane %v1014_v26, %v744_v27  ;;  %v750_v33 = vrot.slane %v1014_v26, %v749_v28 }
 0x79a   :  { %892 = vmatprep.mubr.msk.f32.mxu0 %vm942_vm1, %v941_v15 }
 0x86c   :  { %v533_v40 = vpop.f32.mrb[16].mxu0 }
 0x86d   :  { %v534_v41 = vadd.f32 %v533_v40, %v483_v39  ;;  %v866_v42 = vpop.f32.mrb[17].mxu0 }
 0x86e   :  { %v536_v43 = vpop.f32.mrb[18].mxu0 }
 0x86f   :  { %v540_v44 = vmul.f32 %v534_v41, %v534_v41  ;;  %v537_v45 = vadd.f32 %v536_v43, %v483_v39  ;;  %v867_v46 = vpop.f32.mrb[19].mxu0 }
 0x871   :  { %v542_v47 = vmul.f32 %v540_v44, %v534_v41  ;;  %v541_v48 = vmul.f32 %v537_v45, %v537_v45 }
 0x873   :  { %v544_v49 = vmul.f32 0.044715, %v542_v47  ;;  %v543_v15 = vmul.f32 %v541_v48, %v537_v45 }
 0x875   :  { %v546_v50 = vadd.f32 %v544_v49, %v534_v41  ;;  %v545_v51 = vmul.f32 0.044715, %v543_v15 }
 0x877   :  { %v548_v54 = vmul.f32 0.7978846, %v546_v50  ;;  %v547_v55 = vadd.f32 %v545_v51, %v537_v45 }
 0x879   :  { %935 = vtanh.f32 %v548_v54  ;;  %v549_v57 = vmul.f32 0.7978846, %v547_v55 }
 0x87b   :  { %937 = vtanh.f32 %v549_v57 }
 0x883   :  { %v936_v58 = vpop.eup %935 }
 0x884   :  { %v552_v25 = vadd.f32 1.0, %v936_v58 }
 0x885   :  { %v938_v59 = vpop.eup %937 }
 0x886   :  { %v554_v60 = vmul.f32 0.5, %v552_v25  ;;  %v553_v61 = vadd.f32 1.0, %v938_v59 }
 0x888   :  { %v555_v62 = vmul.f32 0.5, %v553_v61  ;;  %v556_v0 = vmul.f32 %v554_v60, %v534_v41 }
 0x88a   :  { %v557_v63 = vmul.f32 %v555_v62, %v537_v45 }
 0x88c   :  { %v558_v2 = vpack.c.bf16 %v557_v63, %v556_v0 }
 0x88e   :  { %885 = vmatmul.mubr.bf16.vlgmr.msra.gmra.mrb[8].mxu1 %v558_v2 }
 0x961   :  { %v645_v4 = vpop.f32.mrb[8].mxu1 }
 0x962   :  { %v646_v5 = vadd.f32 %v645_v4, %v562_v3  ;;  %v886_v6 = vpop.f32.mrb[9].mxu1 }
 0x963   :  { %v648_v7 = vpop.f32.mrb[10].mxu1 }
 0x964   :  { %v649_v8 = vadd.f32 %v648_v7, %v562_v3  ;;  %v887_v9 = vpop.f32.mrb[11].mxu1  ;;  %v652_v10 = vadd.f32 %v646_v5, %v1073_v52 }
 0x966   :  { %v653_v11 = vadd.f32 %v649_v8, %v1076_v56 }
 0x968   :  { %v896_v12 = vpack.c.bf16 %v653_v11, %v652_v10 }
 0x96a   :  { %897 = vmatpush3.bf16.msra.mxu0 %v896_v12 }
 0x96d   :  { %893 = vmatmul.mubr.msk.f32.vlgmr.msra.gmra.mrb[20].mxu0 %vm655_vm5, %v654_v14 }
 0xa40   :  { %v725_v16 = vpop.f32.mrb[20].mxu0 }
 0xa41   :  { %v729_v30 = vsel %vm50_vm0, %v725_v16, 0.0  ;;  %v894_v17 = vpop.f32.mrb[21].mxu0 }
 0xa42   :  { %730 = vadd.xlane.f32.xlu0 %v729_v30 }
 0xacf   :  { %v731_v18 = vpop.xlane.xlu0 %730 }
 0xad0   :  { %v732_v19 = vmul.f32 0.03125, %v731_v18 }
 0xad2   :  { %v733_v20 = vsub.f32 %v725_v16, %v732_v19 }
 0xad4   :  { %v734_v21 = vmul.f32 %v733_v20, %v733_v20 }
 0xad6   :  { %v735_v52 = vsel %vm50_vm0, %v734_v21, 0.0 }
 0xad7   :  { %736 = vadd.xlane.f32.xlu1 %v735_v52 }
 0xb64   :  { %v737_v56 = vpop.xlane.xlu1 %736 }
 0xb65   :  { %v738_v22 = vmul.f32 0.03125, %v737_v56 }
 0xb67   :  { %v739_v23 = vadd.f32 1e-05, %v738_v22 }
 0xb69   :  { %939 = vrsqrt.f32 %v739_v23 }
 0xb73   :  { %v940_v31 = vpop.eup %939 }
 0xb74   :  { %v741_v32 = vmul.f32 %v940_v31, %v733_v20 }
 0xb76   :  { %v746_v34 = vmul.f32 %v745_v29, %v741_v32 }
 0xb78   :  { %v751_v36 = vadd.f32 %v750_v33, %v746_v34 }
 0xb7a   :  { %v756_v37 = vmul.f32 %v755_v35, %v751_v36 }
 0xb7c   :  { %v757_v38 = vsel %vm50_vm0, %v756_v37, 0.0 }
 0xb7d   :  { %758 = vadd.xlane.f32.xlu0 %v757_v38 }
 0xc0a   :  { %v759_v39 = vpop.xlane.xlu0 %758 }
 0xc0b   :  { %760 = vst [vmem:[%s1162_s5] sm:$0xff] %v759_v39 }

</bundles_post_ra>
